<compile_context>
chip_gen: v7x
topology: tpu7x:2x2x1
jax: 0.10.0
libtpu: 0.0.40
codegen_flags: <defaults>
</compile_context>

<pallas_src>
import functools

import jax
import jax.numpy as jnp
import numpy as np
from jax import lax
from jax.experimental import pallas as pl
from jax.experimental.pallas import tpu as pltpu


def _round_up(x, m):
    return ((x + m - 1) // m) * m


def _latent_kernel(scale_ref,                       # SMEM: (-2*alpha/T,)
                   azz_ref, aee_ref, z_ref, e_ref,  # blocked VMEM inputs
                   matrix_ref, lse_ref,             # outputs
                   m_scratch, l_scratch,            # VMEM scratch (resident per M tile)
                   *, n_actual, tile_n, mask_rows, fold_scale):
    i_n = pl.program_id(1)                 # reduction axis over N (innermost)
    n_blocks = pl.num_programs(1)

    @pl.when(i_n == 0)
    def _init():
        m_scratch[...] = jnp.full(m_scratch.shape, -jnp.inf, dtype=jnp.float32)
        l_scratch[...] = jnp.zeros(l_scratch.shape, dtype=jnp.float32)

    neg2at = scale_ref[0]                  # scalar -2*alpha/T

    z = z_ref[...]                         # (TILE_N, D)
    e = e_ref[...]                         # (TILE_M, D)

    if fold_scale:
        # f32 path: fold the -2*alpha/T scale into the small z operand; the
        # matmul is f32 either way, so this removes tile_n*tile_m VALU mults.
        zs = z.astype(jnp.float32) * neg2at
        cross = lax.dot_general(
            zs, e.astype(jnp.float32),
            dimension_numbers=(((1,), (1,)), ((), ())),
            preferred_element_type=jnp.float32)            # (TILE_N, TILE_M)
        matrix = azz_ref[...] + aee_ref[...] + cross
    else:
        # bf16 path: keep the matmul in the narrow dtype (fast MXU) and scale
        # the f32 accumulator afterwards (avoids re-rounding z).
        cross = lax.dot_general(
            z, e,
            dimension_numbers=(((1,), (1,)), ((), ())),
            preferred_element_type=jnp.float32)            # (TILE_N, TILE_M)
        matrix = azz_ref[...] + aee_ref[...] + neg2at * cross

    matrix_ref[...] = matrix.astype(matrix_ref.dtype)

    def _update(contrib):
        m_prev = m_scratch[...]
        m_new = jnp.maximum(m_prev, jnp.max(contrib, axis=0, keepdims=True))
        l_scratch[...] = (l_scratch[...] * jnp.exp(m_prev - m_new)
                          + jnp.sum(jnp.exp(contrib - m_new), axis=0,
                                    keepdims=True))
        m_scratch[...] = m_new

    if mask_rows:
        # Padded rows only exist in the last N block; mask only there.
        @pl.when(i_n == n_blocks - 1)
        def _masked_update():
            row_idx = lax.broadcasted_iota(jnp.int32, (tile_n, 1), 0)
            valid = row_idx < (n_actual - i_n * tile_n)
            _update(jnp.where(valid, matrix, -jnp.inf))

        @pl.when(i_n != n_blocks - 1)
        def _plain_update():
            _update(matrix)
    else:
        _update(matrix)

    @pl.when(i_n == n_blocks - 1)
    def _finalize():
        lse_ref[...] = m_scratch[...] + jnp.log(l_scratch[...])


def latent_forward(z, e, log_sigma, temperature=1.0, *, tile_n=512, tile_m=1024,
                   matrix_dtype=jnp.float32):
    """JAX/Pallas equivalent of Latent.forward.

    Args:
      z:            (N, D) array -> data['z']
      e:            (M, D) array -> data['e']
      log_sigma:    scalar parameter (shape (1,) like the nn.Parameter)
      temperature:  python float T
      tile_n/tile_m: tile sizes (tile_m rounded to the 128-lane grain).
      matrix_dtype: dtype of the emitted (N, M) matrix (f32 matches the
                    reference; bf16 halves the dominant writeback stream).

    Returns:
      (matrix, lse_loss): matrix is (N, M), lse_loss is a scalar (f32).
    """
    N, z_dim = z.shape
    M, e_dim = e.shape
    assert e_dim == z_dim, "z and e must share the feature dimension"
    T = float(temperature)

    # ---- tile sizing ---------------------------------------------------
    tile_n_eff = min(int(_round_up(tile_n, 8)), _round_up(N, 8))
    m128 = _round_up(M, 128)
    tile_m_aligned = _round_up(int(tile_m), 128)
    if m128 <= tile_m_aligned and m128 >= 256:
        # Would otherwise be a single M tile: split so grid[0] >= 2 and the
        # second v7x TensorCore gets work (harmless on single-TC v5e/v6e).
        tile_m_eff = ((m128 // 128 + 1) // 2) * 128
    else:
        tile_m_eff = min(tile_m_aligned, m128)
    n_pad = _round_up(N, tile_n_eff)
    m_pad = _round_up(M, tile_m_eff)

    if n_pad != N:
        z = jnp.pad(z, ((0, n_pad - N), (0, 0)))
    if m_pad != M:
        e = jnp.pad(e, ((0, m_pad - M), (0, 0)))

    # ---- scalar factors & tiny per-row / per-col norms (wrapper side) ---
    log_sigma32 = jnp.asarray(log_sigma, jnp.float32).reshape((1,))
    # alpha / T = -1 / (2 * exp(log_sigma)^2 * T) = -0.5 * exp(-2*log_sigma) / T
    alpha_over_t = (-0.5 / T) * jnp.exp(-2.0 * log_sigma32)          # (1,)
    neg2_alpha_over_t = -2.0 * alpha_over_t                          # (1,)

    z32 = z.astype(jnp.float32)
    e32 = e.astype(jnp.float32)
    azz = alpha_over_t[0] * jnp.sum(z32 * z32, axis=1, keepdims=True)   # (n_pad, 1)
    aee = (alpha_over_t[0] * jnp.sum(e32 * e32, axis=1))[None, :]       # (1, m_pad)

    fold_scale = (z.dtype == jnp.float32 and e.dtype == jnp.float32)

    grid = (m_pad // tile_m_eff, n_pad // tile_n_eff)   # (M parallel, N reduce)

    kernel = functools.partial(
        _latent_kernel,
        n_actual=N, tile_n=tile_n_eff, mask_rows=(n_pad != N),
        fold_scale=fold_scale)

    # ---- cost / vmem hints ----------------------------------------------
    in_bytes = (int(z.size) * z.dtype.itemsize + int(e.size) * e.dtype.itemsize
                + 4 * (n_pad + m_pad))
    out_itemsize = jnp.dtype(matrix_dtype).itemsize
    cost = pl.CostEstimate(
        flops=2 * n_pad * m_pad * z_dim + 5 * n_pad * m_pad,
        transcendentals=n_pad * m_pad,
        bytes_accessed=out_itemsize * n_pad * m_pad + 4 * m_pad + in_bytes,
    )
    vmem_est = (
        2 * tile_n_eff * z_dim * z.dtype.itemsize      # z blocks (double buffered)
        + 2 * tile_m_eff * z_dim * e.dtype.itemsize    # e blocks
        + 2 * tile_n_eff * tile_m_eff * out_itemsize   # matrix blocks
        + 2 * tile_n_eff * 4                           # azz blocks
        + 2 * tile_m_eff * 4                           # aee blocks
        + 2 * tile_m_eff * 4                           # lse blocks
        + 2 * tile_m_eff * 4                           # m/l scratch
    )
    vmem_limit = int(min(max(32 * 1024 * 1024, int(vmem_est * 1.5)),
                         64 * 1024 * 1024))

    # TODO(synk): optionally sweep pl.Buffered(3) on the matrix out_spec if the
    # writeback DMA is exposed at M-tile boundaries (measure before adopting).
    matrix_pad, lse_pad = pl.pallas_call(
        kernel,
        out_shape=(
            jax.ShapeDtypeStruct((n_pad, m_pad), matrix_dtype),
            jax.ShapeDtypeStruct((1, m_pad), jnp.float32),
        ),
        grid_spec=pltpu.PrefetchScalarGridSpec(
            num_scalar_prefetch=0,
            grid=grid,
            in_specs=[
                pl.BlockSpec(memory_space=pltpu.SMEM),                       # -2*alpha/T
                pl.BlockSpec((tile_n_eff, 1), lambda j, i: (i, 0)),          # alpha/T*||z||^2
                pl.BlockSpec((1, tile_m_eff), lambda j, i: (0, j)),          # alpha/T*||e||^2
                pl.BlockSpec((tile_n_eff, z_dim), lambda j, i: (i, 0)),      # z
                pl.BlockSpec((tile_m_eff, z_dim), lambda j, i: (j, 0)),      # e
            ],
            out_specs=(
                pl.BlockSpec((tile_n_eff, tile_m_eff), lambda j, i: (i, j)),  # matrix
                pl.BlockSpec((1, tile_m_eff), lambda j, i: (0, j)),           # lse
            ),
            scratch_shapes=[
                pltpu.VMEM((1, tile_m_eff), jnp.float32),   # running max m
                pltpu.VMEM((1, tile_m_eff), jnp.float32),   # running sum l
            ],
        ),
        compiler_params=pltpu.CompilerParams(
            dimension_semantics=("parallel", "arbitrary"),
            vmem_limit_bytes=vmem_limit),
        cost_estimate=cost,
    )(neg2_alpha_over_t, azz, aee, z, e)

    matrix = matrix_pad[:N, :M]
    lse = lse_pad[0, :M]

    # NOTE: '- 1.0' below is '- np.log(np.e)' from the reference; do not "fix".
    loss = (-T * jnp.mean(lse)
            + 0.5 * float(z_dim) * (2.0 * log_sigma32[0] - 1.0)
            + float(np.log(N)))
    return matrix, loss


def _reference(z, e, log_sigma, temperature=1.0):
    N, z_dim = z.shape
    T = temperature
    distance = jnp.sum((z[:, None, :] - e[None, :, :]) ** 2, axis=2)
    alpha = -1.0 / (2.0 * jnp.exp(log_sigma[0]) ** 2)
    matrix = alpha * distance / T
    loss = -jnp.mean(T * jax.nn.logsumexp(matrix, axis=0))
    loss = loss + 0.5 * z_dim * (2.0 * log_sigma[0] - np.log(np.e)) + np.log(N)
    return matrix, loss


def _check(N, M, D, temperature, seed, log_sigma_val, **tile_kwargs):
    key = jax.random.PRNGKey(seed)
    kz, ke = jax.random.split(key)
    z = jax.random.normal(kz, (N, D), dtype=jnp.float32)
    e = jax.random.normal(ke, (M, D), dtype=jnp.float32)
    log_sigma = jnp.full((1,), log_sigma_val, dtype=jnp.float32)

    matrix, loss = latent_forward(z, e, log_sigma, temperature=temperature,
                                  **tile_kwargs)
    jax.block_until_ready((matrix, loss))

    ref_matrix, ref_loss = _reference(z, e, log_sigma, temperature=temperature)
    np.testing.assert_allclose(np.asarray(matrix), np.asarray(ref_matrix),
                               rtol=1e-4, atol=1e-4)
    np.testing.assert_allclose(np.asarray(loss), np.asarray(ref_loss),
                               rtol=1e-4, atol=1e-4)


if __name__ == "__main__":
    # Small aligned-ish case (single tile, M padded to 128 lanes).
    _check(N=8, M=8, D=32, temperature=1.0, seed=0, log_sigma_val=0.0)
    # Unaligned case with default (large) tiles: exercises the M-tile split
    # (grid[0] = 2) and padded-row masking on the (single) last N block.
    _check(N=300, M=200, D=32, temperature=0.7, seed=0, log_sigma_val=0.25)
    # Small explicit tiles: exercises the multi-step online logsumexp across
    # N blocks with the mask applied only on the last block.
    _check(N=300, M=200, D=32, temperature=0.7, seed=1, log_sigma_val=-0.1,
           tile_n=128, tile_m=128)

    print("KERNEL_OK")
</pallas_src>

<mosaic_0001>
module attributes {stable_mosaic.version = 11 : i64} {
  func.func @_latent_kernel(%arg0: i32, %arg1: i32, %arg2: memref<1xf32, #tpu.memory_space<smem>>, %arg3: memref<8x1xf32, #tpu.memory_space<vmem>>, %arg4: memref<1x128xf32, #tpu.memory_space<vmem>>, %arg5: memref<8x32xf32, #tpu.memory_space<vmem>>, %arg6: memref<128x32xf32, #tpu.memory_space<vmem>>, %arg7: memref<8x128xf32, #tpu.memory_space<vmem>>, %arg8: memref<1x128xf32, #tpu.memory_space<vmem>>, %arg9: memref<1x128xf32, #tpu.memory_space<vmem>>, %arg10: memref<1x128xf32, #tpu.memory_space<vmem>>) attributes {dimension_semantics = [#tpu.dimension_semantics<parallel>, #tpu.dimension_semantics<arbitrary>], iteration_bounds = array<i64: 1, 1>, scalar_prefetch = 0 : i64, scratch_operands = 2 : i64, tpu.core_type = #tpu.core_type<tc>, window_params = [{transform_indices = @transform_0, window_bounds = array<i64: 1>}, {transform_indices = @transform_1, window_bounds = array<i64: 8, 1>}, {transform_indices = @transform_2, window_bounds = array<i64: 1, 128>}, {transform_indices = @transform_3, window_bounds = array<i64: 8, 32>}, {transform_indices = @transform_4, window_bounds = array<i64: 128, 32>}, {transform_indices = @transform_5, window_bounds = array<i64: 8, 128>}, {transform_indices = @transform_6, window_bounds = array<i64: 1, 128>}]} {
    %c0_i32 = arith.constant 0 : i32
    %0 = arith.cmpi eq, %arg1, %c0_i32 : i32
    %1 = arith.extui %0 : i1 to i32
    %c0_i32_0 = arith.constant 0 : i32
    %2 = arith.cmpi ne, %1, %c0_i32_0 : i32
    scf.if %2 {
      %cst_23 = arith.constant 0xFF800000 : f32
      %35 = vector.broadcast %cst_23 : f32 to vector<1x128xf32>
      %c0_24 = arith.constant 0 : index
      %c0_25 = arith.constant 0 : index
      %36 = vector.load %arg9[%c0_24, %c0_25] : memref<1x128xf32, #tpu.memory_space<vmem>>, vector<1x128xf32>
      tpu.vector_store %arg9[%c0_24, %c0_25], %35 {strides = array<i32>} : memref<1x128xf32, #tpu.memory_space<vmem>>, vector<1x128xf32>,
      %cst_26 = arith.constant 0.000000e+00 : f32
      %37 = vector.broadcast %cst_26 : f32 to vector<1x128xf32>
      %c0_27 = arith.constant 0 : index
      %c0_28 = arith.constant 0 : index
      %38 = vector.load %arg10[%c0_27, %c0_28] : memref<1x128xf32, #tpu.memory_space<vmem>>, vector<1x128xf32>
      tpu.vector_store %arg10[%c0_27, %c0_28], %37 {strides = array<i32>} : memref<1x128xf32, #tpu.memory_space<vmem>>, vector<1x128xf32>,
    } else {
    }
    %c0 = arith.constant 0 : index
    %3 = memref.load %arg2[%c0] : memref<1xf32, #tpu.memory_space<smem>>
    %c0_1 = arith.constant 0 : index
    %c0_2 = arith.constant 0 : index
    %4 = vector.load %arg5[%c0_1, %c0_2] : memref<8x32xf32, #tpu.memory_space<vmem>>, vector<8x32xf32>
    %c0_3 = arith.constant 0 : index
    %c0_4 = arith.constant 0 : index
    %5 = vector.load %arg6[%c0_3, %c0_4] : memref<128x32xf32, #tpu.memory_space<vmem>>, vector<128x32xf32>
    %6 = vector.broadcast %3 : f32 to vector<8x32xf32>
    %7 = arith.mulf %4, %6 : vector<8x32xf32>
    %cst = arith.constant dense<0.000000e+00> : vector<8x128xf32>
    %8 = tpu.matmul %7, %5, %cst {dimension_numbers = #tpu.dot_dimension_numbers<[1], [1], [0], [0], [0, 0, 1, 0], [], []>} : vector<8x32xf32>, vector<128x32xf32>, vector<8x128xf32> -> vector<8x128xf32>
    %c0_5 = arith.constant 0 : index
    %c0_6 = arith.constant 0 : index
    %9 = vector.load %arg3[%c0_5, %c0_6] : memref<8x1xf32, #tpu.memory_space<vmem>>, vector<8x1xf32>
    %c0_7 = arith.constant 0 : index
    %c0_8 = arith.constant 0 : index
    %10 = vector.load %arg4[%c0_7, %c0_8] : memref<1x128xf32, #tpu.memory_space<vmem>>, vector<1x128xf32>
    %11 = vector.broadcast %9 : vector<8x1xf32> to vector<8x128xf32>
    %12 = vector.broadcast %10 : vector<1x128xf32> to vector<8x128xf32>
    %13 = arith.addf %11, %12 : vector<8x128xf32>
    %14 = arith.addf %13, %8 : vector<8x128xf32>
    %c0_9 = arith.constant 0 : index
    %c0_10 = arith.constant 0 : index
    %15 = vector.load %arg7[%c0_9, %c0_10] : memref<8x128xf32, #tpu.memory_space<vmem>>, vector<8x128xf32>
    tpu.vector_store %arg7[%c0_9, %c0_10], %14 {strides = array<i32>} : memref<8x128xf32, #tpu.memory_space<vmem>>, vector<8x128xf32>,
    %c0_11 = arith.constant 0 : index
    %c0_12 = arith.constant 0 : index
    %16 = vector.load %arg9[%c0_11, %c0_12] : memref<1x128xf32, #tpu.memory_space<vmem>>, vector<1x128xf32>
    %cst_13 = arith.constant dense<0xFF800000> : vector<128xf32>
    %17 = vector.multi_reduction <maximumf>, %14, %cst_13 [0] : vector<8x128xf32> to vector<128xf32>
    %18 = vector.shape_cast %17 : vector<128xf32> to vector<1x128xf32>
    %19 = arith.maximumf %16, %18 : vector<1x128xf32>
    %c0_14 = arith.constant 0 : index
    %c0_15 = arith.constant 0 : index
    %20 = vector.load %arg10[%c0_14, %c0_15] : memref<1x128xf32, #tpu.memory_space<vmem>>, vector<1x128xf32>
    %21 = arith.subf %16, %19 : vector<1x128xf32>
    %22 = math.exp %21 : vector<1x128xf32>
    %23 = arith.mulf %20, %22 : vector<1x128xf32>
    %24 = vector.broadcast %19 : vector<1x128xf32> to vector<8x128xf32>
    %25 = arith.subf %14, %24 : vector<8x128xf32>
    %26 = math.exp %25 : vector<8x128xf32>
    %cst_16 = arith.constant dense<0.000000e+00> : vector<128xf32>
    %27 = vector.multi_reduction <add>, %26, %cst_16 [0] : vector<8x128xf32> to vector<128xf32>
    %28 = vector.shape_cast %27 : vector<128xf32> to vector<1x128xf32>
    %29 = arith.addf %23, %28 : vector<1x128xf32>
    %c0_17 = arith.constant 0 : index
    %c0_18 = arith.constant 0 : index
    %30 = vector.load %arg10[%c0_17, %c0_18] : memref<1x128xf32, #tpu.memory_space<vmem>>, vector<1x128xf32>
    tpu.vector_store %arg10[%c0_17, %c0_18], %29 {strides = array<i32>} : memref<1x128xf32, #tpu.memory_space<vmem>>, vector<1x128xf32>,
    %c0_19 = arith.constant 0 : index
    %c0_20 = arith.constant 0 : index
    %31 = vector.load %arg9[%c0_19, %c0_20] : memref<1x128xf32, #tpu.memory_space<vmem>>, vector<1x128xf32>
    tpu.vector_store %arg9[%c0_19, %c0_20], %19 {strides = array<i32>} : memref<1x128xf32, #tpu.memory_space<vmem>>, vector<1x128xf32>,
    %c0_i32_21 = arith.constant 0 : i32
    %32 = arith.cmpi eq, %arg1, %c0_i32_21 : i32
    %33 = arith.extui %32 : i1 to i32
    %c0_i32_22 = arith.constant 0 : i32
    %34 = arith.cmpi ne, %33, %c0_i32_22 : i32
    scf.if %34 {
      %c0_23 = arith.constant 0 : index
      %c0_24 = arith.constant 0 : index
      %35 = vector.load %arg9[%c0_23, %c0_24] : memref<1x128xf32, #tpu.memory_space<vmem>>, vector<1x128xf32>
      %c0_25 = arith.constant 0 : index
      %c0_26 = arith.constant 0 : index
      %36 = vector.load %arg10[%c0_25, %c0_26] : memref<1x128xf32, #tpu.memory_space<vmem>>, vector<1x128xf32>
      %37 = math.log %36 : vector<1x128xf32>
      %38 = arith.addf %35, %37 : vector<1x128xf32>
      %c0_27 = arith.constant 0 : index
      %c0_28 = arith.constant 0 : index
      %39 = vector.load %arg8[%c0_27, %c0_28] : memref<1x128xf32, #tpu.memory_space<vmem>>, vector<1x128xf32>
      tpu.vector_store %arg8[%c0_27, %c0_28], %38 {strides = array<i32>} : memref<1x128xf32, #tpu.memory_space<vmem>>, vector<1x128xf32>,
    } else {
    }
    return
  }
  func.func @transform_0(%arg0: i32, %arg1: i32) -> i32 {
    %c0_i32 = arith.constant 0 : i32
    %c0_i32_0 = arith.constant 0 : i32
    return %c0_i32 : i32
  }
  func.func @transform_1(%arg0: i32, %arg1: i32) -> (i32, i32) {
    %c0_i32 = arith.constant 0 : i32
    %c0_i32_0 = arith.constant 0 : i32
    return %arg1, %c0_i32 : i32, i32
  }
  func.func @transform_2(%arg0: i32, %arg1: i32) -> (i32, i32) {
    %c0_i32 = arith.constant 0 : i32
    %c0_i32_0 = arith.constant 0 : i32
    return %c0_i32, %arg0 : i32, i32
  }
  func.func @transform_3(%arg0: i32, %arg1: i32) -> (i32, i32) {
    %c0_i32 = arith.constant 0 : i32
    %c0_i32_0 = arith.constant 0 : i32
    return %arg1, %c0_i32 : i32, i32
  }
  func.func @transform_4(%arg0: i32, %arg1: i32) -> (i32, i32) {
    %c0_i32 = arith.constant 0 : i32
    %c0_i32_0 = arith.constant 0 : i32
    return %arg0, %c0_i32 : i32, i32
  }
  func.func @transform_5(%arg0: i32, %arg1: i32) -> (i32, i32) {
    %c0_i32 = arith.constant 0 : i32
    return %arg1, %arg0 : i32, i32
  }
  func.func @transform_6(%arg0: i32, %arg1: i32) -> (i32, i32) {
    %c0_i32 = arith.constant 0 : i32
    %c0_i32_0 = arith.constant 0 : i32
    return %c0_i32, %arg0 : i32, i32
  }
}

</mosaic_0001>

<bundles_post_ra>
// kernel: tpu_custom_call.1
= control target key start
LH: loop header
LB: loop body
LE: loop exit
PB: predicated region body
PF: predicated region fallthrough
CT: control target
= control target key end

     0   :  { %13 = vsyncpa [#allocation6], 0  ;;  %vm51_vm0 = vcmask 261120   ;;  %v421_v2 = vmov 0.0|0.0   ;;  %v422_v5 = vmov 0.0   ;;  %vm423_vm2 = vmmov 0   ;;  %s570_s0 = inlined_call_operand.<no memory space> [shape: f32[1], index: 0, kind: input, shape index: {}]   ;;  %s571_s1 = inlined_call_operand.vmem [shape: f32[8,1], index: 1, kind: input, shape index: {}]   ;;  %s572_s2 = inlined_call_operand.vmem [shape: f32[1,128], index: 2, kind: input, shape index: {}]   ;;  %s573_s3 = inlined_call_operand.vmem [shape: f32[8,32], index: 3, kind: input, shape index: {}]   ;;  %s574_s4 = inlined_call_operand.vmem [shape: f32[128,32], index: 4, kind: input, shape index: {}]   ;;  %s575_s5 = inlined_call_operand.hbm [shape: f32[8,128], index: 5, kind: output, shape index: {0}]   ;;  %s576_s6 = inlined_call_operand.hbm [shape: f32[1,128], index: 6, kind: output, shape index: {1}]  }
   0x1   :  { %v33_v0 = vld [vmem:[%s574_s4] sm:$0xff]  ;;  %v34_v1 = vld [vmem:[%s574_s4 + $0x8] sm:$0xff]  ;;  %327 = vmatprep.subr.bf16.mxu0 %v421_v2  ;;  %vm471_vm1 = vmpackc.low %vm51_vm0, %vm51_vm0  ;;  %30 = vst [vmem:[#allocation3] sm:$0x1] %v422_v5  ;;  %324 = vmatprep.mubr.msk.f32.mxu0 %vm423_vm2, %v422_v5  ;;  %v424_v6 = vmov 0  }
   0x2   :  { %v328_v3 = vpack.c.bf16 %v34_v1, %v33_v0  ;;  %366 = vset.pattern.permute.xlu0 %v424_v6  ;;  %v35_v7 = vld [vmem:[%s574_s4 + $0x10] sm:$0xff]  ;;  %v36_v8 = vld [vmem:[%s574_s4 + $0x18] sm:$0xff]  ;;  %v173_v9 = vld [vmem:[%s571_s1] sm:$0xff] }
   0x4   :  { %330 = vmatpush3.bf16.xpose.msk.msra.mxu0 %vm471_vm1, %v328_v3 }
   0x5   :  { %331 = vmatprep.subr.bf16.mxu0 %v421_v2 }
   0x6   :  { %14 = vsyncpa [#allocation8], 0  ;;  %v332_v10 = vpack.c.bf16 %v36_v8, %v35_v7  ;;  %177 = vperm.xlu0 %366, %v173_v9   ;;  %v425_v11 = vmov -inf   ;;  %v37_v12 = vld [vmem:[%s574_s4 + $0x20] sm:$0xff]  ;;  %v38_v13 = vld [vmem:[%s574_s4 + $0x28] sm:$0xff]  ;;  %v49_v31 = vstv %s570_s0 }
   0x7   :  { %29 = vst [vmem:[#allocation2] sm:$0x1] %v425_v11  ;;  %v336_v14 = vpack.c.bf16 %v38_v13, %v37_v12  ;;  %v39_v15 = vld [vmem:[%s574_s4 + $0x30] sm:$0xff]  ;;  %v40_v16 = vld [vmem:[%s574_s4 + $0x38] sm:$0xff]  ;;  %v41_v18 = vld [vmem:[%s574_s4 + $0x40] sm:$0xff] }
   0x8   :  { %v340_v17 = vpack.c.bf16 %v40_v16, %v39_v15  ;;  %v42_v19 = vld [vmem:[%s574_s4 + $0x48] sm:$0xff]  ;;  %v43_v21 = vld [vmem:[%s574_s4 + $0x50] sm:$0xff]  ;;  %v44_v22 = vld [vmem:[%s574_s4 + $0x58] sm:$0xff] }
   0x9   :  { %v344_v20 = vpack.c.bf16 %v42_v19, %v41_v18  ;;  %v348_v23 = vpack.c.bf16 %v44_v22, %v43_v21  ;;  %v45_v24 = vld [vmem:[%s574_s4 + $0x60] sm:$0xff]  ;;  %v46_v25 = vld [vmem:[%s574_s4 + $0x68] sm:$0xff]  ;;  %v47_v27 = vld [vmem:[%s574_s4 + $0x70] sm:$0xff] }
   0xa   :  { %v352_v26 = vpack.c.bf16 %v46_v25, %v45_v24  ;;  %v48_v28 = vld [vmem:[%s574_s4 + $0x78] sm:$0xff]  ;;  %v32_v30 = vld [vmem:[%s573_s3] sm:$0xff]  ;;  %s426_s4 = smov [#allocation5]  }
   0xb   :  { %v356_v29 = vpack.c.bf16 %v48_v28, %v47_v27  ;;  %v50_v32 = vmul.f32 %v49_v31, %v32_v30  ;;  %v274_v33 = vld [vmem:[%s572_s2] ss:$0 sm:$0xff]  ;;  %s235_s11 = sshll.u32 %s426_s4, 4  ;;  %s236_s11 = int_to_ptr.vmem [resolvable:$true] %s235_s11 }
   0xc   :  { %334 = vmatpush3.bf16.xpose.msk.msra.mxu0 %vm471_vm1, %v332_v10  ;;  %s373_s3 = scalar_lea.vmem %s236_s11, 128  ;;  %p378_p1 = scmp.lt.s32.totalorder %s236_s11, %s236_s11 }
   0xd   :  { %335 = vmatprep.subr.bf16.mxu0 %v421_v2  ;;  %p374_p0 = scmp.ne.s32.totalorder %s236_s11, %s373_s3  ;;  %p379_p2 = scmp.lt.s32.totalorder %s373_s3, %s373_s3 }
   0xf   :  { %p380_p3 = por %p379_p2, %p378_p1 }
  0x11   :  { %p381_p4 = pnand %p380_p3, %p374_p0 }
  0x14   :  { %338 = vmatpush3.bf16.xpose.msk.msra.mxu0 %vm471_vm1, %v336_v14 }
  0x15   :  { %339 = vmatprep.subr.bf16.mxu0 %v421_v2 }
  0x1c   :  { %342 = vmatpush3.bf16.xpose.msk.msra.mxu0 %vm471_vm1, %v340_v17 }
  0x1d   :  { %343 = vmatprep.subr.bf16.mxu0 %v421_v2 }
  0x24   :  { %346 = vmatpush3.bf16.xpose.msk.msra.mxu0 %vm471_vm1, %v344_v20 }
  0x25   :  { %347 = vmatprep.subr.bf16.mxu0 %v421_v2 }
  0x2c   :  { %350 = vmatpush3.bf16.xpose.msk.msra.mxu0 %vm471_vm1, %v348_v23 }
  0x2d   :  { %351 = vmatprep.subr.bf16.mxu0 %v421_v2 }
  0x34   :  { %354 = vmatpush3.bf16.xpose.msk.msra.mxu0 %vm471_vm1, %v352_v26 }
  0x35   :  { %355 = vmatprep.subr.bf16.mxu0 %v421_v2 }
  0x3c   :  { %358 = vmatpush3.bf16.xpose.msk.msra.mxu0 %vm471_vm1, %v356_v29 }
  0x43   :  { %325 = vmatmul.mubr.msk.f32.vlgmr.msra.gmra.mrb[0].mxu0 %vm51_vm0, %v50_v32 }
  0x85   :  { %v178_v34 = vpop.permute.xlu0 %177 }
  0x86   :  { %v186_v35 = vadd.f32 %v274_v33, %v178_v34 }
 0x116   :  { %v169_v36 = vpop.f32.mrb[0].mxu0 }
 0x117   :  { %v187_v37 = vadd.f32 %v186_v35, %v169_v36  ;;  %v326_v38 = vpop.f32.mrb[1].mxu0 }
 0x119   :  { %v190_v39 = vrot.slane %v187_v37, 4  ;;  %188 = vst [vmem:[#allocation5] sm:$0xff] %v187_v37 }
 0x11a   :  { %384 = shalt.err (!%p381_p4)
}
 0x11b   :  { %s385_s2 = scalar_lea.hbm %s575_s5, 128 }
 0x11c   :  { %p386_p5 = scmp.ne.s32.totalorder %s575_s5, %s385_s2  ;;  %p389_p6 = scmp.lt.u32.totalorder %s385_s2, %s575_s5 }
 0x11e   :  { %p391_p7 = pnand %p389_p6, %p386_p5 }
 0x120   :  { %394 = shalt.err (!%p391_p7)
}
 0x121   :  { %238 = dma.vmem_to_hbm [thread:$0]  %s236_s11, 128, %s575_s5, [#allocation6]   ;;  %v191_v40 = vmax.f32 %v187_v37, %v190_v39  ;;  %v203_v41 = vlaneseq  ;;  %v189_v46 = vld [vmem:[#allocation2] sm:$0x1]  ;;  %v197_v61 = vld [vmem:[#allocation3] sm:$0x1] }
 0x122   :  { %s427_s5 = smov [#allocation7]  }
 0x123   :  { %v192_v42 = vrot.slane %v191_v40, 2  ;;  %v204_v44 = vshrl.u32 %v203_v41, 7  ;;  %s245_s19 = sshll.u32 %s427_s5, 4  ;;  %s246_s19 = int_to_ptr.vmem [resolvable:$true] %s245_s19 }
 0x124   :  { %s395_s20 = scalar_lea.vmem %s246_s19, 16  ;;  %s399_s21 = scalar_lea.vmem %s246_s19, 32 }
 0x125   :  { %v193_v43 = vmax.f32 %v191_v40, %v192_v42  ;;  %v205_v48 = vsub.s32 0, %v204_v44  ;;  %p396_p8 = scmp.ne.s32.totalorder %s246_s19, %s395_s20  ;;  %p400_p9 = scmp.lt.s32.totalorder %s246_s19, %s246_s19 }
 0x126   :  { %p401_p10 = scmp.lt.s32.totalorder %s399_s21, %s395_s20 }
 0x127   :  { %v194_v45 = vrot.slane %v193_v43, 1 }
 0x128   :  { %p402_p11 = por %p401_p10, %p400_p9 }
 0x129   :  { %v195_v47 = vmax.f32 %v193_v43, %v194_v45 }
 0x12a   :  { %p403_p12 = pnand %p402_p11, %p396_p8 }
 0x12b   :  { %v196_v49 = vmax.f32 %v189_v46, %v195_v47 }
 0x12d   :  { %v206_v50 = vrot.slane %v196_v49, %v205_v48  ;;  %219 = vst [vmem:[#allocation2] sm:$0x1] %v196_v49  ;;  %v198_v53 = vsub.f32 %v189_v46, %v196_v49 }
 0x12f   :  { %v208_v51 = vsub.f32 %v187_v37, %v206_v50  ;;  %v199_v54 = vmul.f32 1.442695, %v198_v53 }
 0x131   :  { %v209_v52 = vmul.f32 1.442695, %v208_v51 }
 0x133   :  { %367 = vpow2.f32 %v209_v52 }
 0x134   :  { %369 = vpow2.f32 %v199_v54  ;;  %v223_v5 = vld [vmem:[#allocation2] sm:$0x1] }
 0x13d   :  { %v368_v55 = vpop.eup %367 }
 0x13e   :  { %v211_v56 = vrot.slane %v368_v55, 4  ;;  %v370_v60 = vpop.eup %369 }
 0x13f   :  { %v201_v63 = vmul.f32 %v370_v60, %v197_v61 }
 0x140   :  { %v212_v57 = vadd.f32 %v368_v55, %v211_v56 }
 0x142   :  { %v213_v58 = vrot.slane %v212_v57, 2 }
 0x144   :  { %v214_v59 = vadd.f32 %v213_v58, %v212_v57 }
 0x146   :  { %v215_v62 = vrot.slane %v214_v59, 1 }
 0x148   :  { %v216_v0 = vadd.f32 %v215_v62, %v214_v59 }
 0x14a   :  { %v217_v1 = vadd.f32 %v216_v0, %v201_v63 }
 0x14c   :  { %218 = vst [vmem:[#allocation3] sm:$0x1] %v217_v1 }
 0x153   :  { %v224_v2 = vld [vmem:[#allocation3] sm:$0x1] }
 0x154   :  { %371 = vlog2.f32 %v224_v2 }
 0x15e   :  { %v372_v3 = vpop.eup %371 }
 0x15f   :  { %v226_v4 = vmul.f32 0.6931472, %v372_v3 }
 0x161   :  { %v227_v6 = vadd.f32 %v226_v4, %v223_v5 }
 0x163   :  { %228 = vst [vmem:[#allocation7] sm:$0x1] %v227_v6 }
 0x164   :  { %406 = shalt.err (!%p403_p12)
}
 0x165   :  { %s407_s24 = scalar_lea.hbm %s576_s6, 16 }
 0x166   :  { %p408_p13 = scmp.ne.s32.totalorder %s576_s6, %s407_s24  ;;  %p411_p0 = scmp.lt.u32.totalorder %s407_s24, %s576_s6 }
 0x168   :  { %p413_p1 = pnand %p411_p0, %p408_p13 }
 0x16a   :  { %416 = shalt.err (!%p413_p1)
}
 0x16b   :  { %248 = dma.vmem_to_hbm [thread:$0]  %s246_s19, 16, %s576_s6, [#allocation8]  }
 0x16c   :  { %417 = dma.done.wait [#allocation6], 128  }
 0x16d   :  { %418 = vsyncadd [#allocation6], 4294967168 }
 0x16e   :  { %419 = dma.done.wait [#allocation8], 16  }
 0x16f   :  { %420 = vsyncadd [#allocation8], 4294967280 }
 0x170   :  { %255 = vsyncpa [#allocation6], 1 }
 0x171   :  { %256 = vsyncpa [#allocation8], 1 }

</bundles_post_ra>
